<compile_context>
chip_gen: v6e
topology: v6e:2x2x1
jax: 0.10.0
libtpu: 0.0.40
codegen_flags: <defaults>
</compile_context>

<pallas_src>
import jax
import jax.numpy as jnp
from jax.experimental import pallas as pl
from jax.experimental.pallas import tpu as pltpu

INPUT_SIZE = 100
HIDDEN_SIZE = 50
H_PAD = 128          # lane-padded hidden width (zero-padded; keeps h lane-dense)
TM_MAX = 1024        # max batch tile rows (multiple of 8; far under VMEM budget)


def _round_up(n: int, m: int) -> int:
    return ((n + m - 1) // m) * m


def _mlp_kernel(x_ref, w1_ref, b1_ref, w2_ref, b2_ref, o_ref):
    # fc1: (tm, 100) @ (100, 128) + (1, 128)   [hidden cols >= 50 are exact zeros]
    h = jnp.dot(x_ref[...], w1_ref[...], preferred_element_type=jnp.float32)
    h = jnp.maximum(h + b1_ref[...], 0.0)      # ReLU; padded cols stay 0
    # fc2: (tm, 128) @ (128, 100) + (1, 100)   [padded rows of w2 are zeros]
    out = jnp.dot(h, w2_ref[...], preferred_element_type=jnp.float32)
    o_ref[...] = (out + b2_ref[...]).astype(o_ref.dtype)


def prepare_params(w1, b1, w2, b2):
    """One-time prep: transpose to (in, out) layout; zero-pad hidden dim to 128.

    Inputs follow PyTorch nn.Linear conventions:
      w1: (hidden, input), b1: (hidden,), w2: (input, hidden), b2: (input,)
    """
    w1_t = jnp.zeros((INPUT_SIZE, H_PAD), jnp.float32)
    w1_t = w1_t.at[:, :HIDDEN_SIZE].set(jnp.transpose(w1).astype(jnp.float32))
    b1_p = jnp.zeros((1, H_PAD), jnp.float32).at[0, :HIDDEN_SIZE].set(b1)

    w2_t = jnp.zeros((H_PAD, INPUT_SIZE), jnp.float32)
    w2_t = w2_t.at[:HIDDEN_SIZE, :].set(jnp.transpose(w2).astype(jnp.float32))
    b2_p = jnp.asarray(b2, jnp.float32).reshape(1, INPUT_SIZE)

    return w1_t, b1_p, w2_t, b2_p


@jax.jit
def simple_nn_forward(x, w1_t, b1_p, w2_t, b2_p):
    """x: (B, INPUT_SIZE) f32. Params already prepared by prepare_params()."""
    B = x.shape[0]
    # Batch tile: multiple of 8 sublanes, capped at TM_MAX, and sized so the
    # grid has >= 2 steps whenever B allows it (v7x: both TCs split the batch).
    tm = max(8, min(TM_MAX, _round_up(-(-B // 2), 8)))
    grid = (pl.cdiv(B, tm),)   # partial last block is masked by Pallas

    return pl.pallas_call(
        _mlp_kernel,
        out_shape=jax.ShapeDtypeStruct((B, INPUT_SIZE), x.dtype),
        grid=grid,
        in_specs=[
            pl.BlockSpec((tm, INPUT_SIZE), lambda i: (i, 0)),     # x tile (pipelined)
            pl.BlockSpec((INPUT_SIZE, H_PAD), lambda i: (0, 0)),  # w1 (resident)
            pl.BlockSpec((1, H_PAD), lambda i: (0, 0)),           # b1 (resident)
            pl.BlockSpec((H_PAD, INPUT_SIZE), lambda i: (0, 0)),  # w2 (resident)
            pl.BlockSpec((1, INPUT_SIZE), lambda i: (0, 0)),      # b2 (resident)
        ],
        out_specs=pl.BlockSpec((tm, INPUT_SIZE), lambda i: (i, 0)),
        compiler_params=pltpu.CompilerParams(
            dimension_semantics=("parallel",),
        ),
    )(x, w1_t, b1_p, w2_t, b2_p)


def init_params(key):
    """Deterministic init mirroring nn.Linear shapes (Kaiming-uniform-ish)."""
    k1, k2, k3, k4 = jax.random.split(key, 4)
    bound1 = 1.0 / (INPUT_SIZE ** 0.5)
    bound2 = 1.0 / (HIDDEN_SIZE ** 0.5)
    w1 = jax.random.uniform(k1, (HIDDEN_SIZE, INPUT_SIZE), jnp.float32,
                            minval=-bound1, maxval=bound1)
    b1 = jax.random.uniform(k2, (HIDDEN_SIZE,), jnp.float32,
                            minval=-bound1, maxval=bound1)
    w2 = jax.random.uniform(k3, (INPUT_SIZE, HIDDEN_SIZE), jnp.float32,
                            minval=-bound2, maxval=bound2)
    b2 = jax.random.uniform(k4, (INPUT_SIZE,), jnp.float32,
                            minval=-bound2, maxval=bound2)
    return w1, b1, w2, b2


if __name__ == "__main__":
    key = jax.random.PRNGKey(0)
    k_x, k_p = jax.random.split(key)

    B = 8
    x = jax.random.normal(k_x, (B, INPUT_SIZE), dtype=jnp.float32)
    w1, b1, w2, b2 = init_params(k_p)

    # One-time param preparation (hoisted off the forward critical path).
    w1_t, b1_p, w2_t, b2_p = prepare_params(w1, b1, w2, b2)

    out = simple_nn_forward(x, w1_t, b1_p, w2_t, b2_p)
    out = jax.block_until_ready(out)

    # Reference check in plain JAX (same math as the PyTorch forward).
    ref = jnp.maximum(x @ w1.T + b1, 0.0) @ w2.T + b2
    assert out.shape == (B, INPUT_SIZE)
    assert jnp.allclose(out, ref, atol=1e-5, rtol=1e-5)

    print("KERNEL_OK")
</pallas_src>

<mosaic_0001>
module attributes {stable_mosaic.version = 11 : i64} {
  func.func @_mlp_kernel(%arg0: i32, %arg1: memref<8x100xf32, #tpu.memory_space<vmem>>, %arg2: memref<100x128xf32, #tpu.memory_space<vmem>>, %arg3: memref<1x128xf32, #tpu.memory_space<vmem>>, %arg4: memref<128x100xf32, #tpu.memory_space<vmem>>, %arg5: memref<1x100xf32, #tpu.memory_space<vmem>>, %arg6: memref<8x100xf32, #tpu.memory_space<vmem>>) attributes {dimension_semantics = [#tpu.dimension_semantics<parallel>], iteration_bounds = array<i64: 1>, scalar_prefetch = 0 : i64, scratch_operands = 0 : i64, tpu.core_type = #tpu.core_type<tc>, window_params = [{transform_indices = @transform_0, window_bounds = array<i64: 8, 100>}, {pipeline_mode = #tpu.pipeline_mode<synchronous>, transform_indices = @transform_1, window_bounds = array<i64: 100, 128>}, {pipeline_mode = #tpu.pipeline_mode<synchronous>, transform_indices = @transform_2, window_bounds = array<i64: 1, 128>}, {pipeline_mode = #tpu.pipeline_mode<synchronous>, transform_indices = @transform_3, window_bounds = array<i64: 128, 100>}, {pipeline_mode = #tpu.pipeline_mode<synchronous>, transform_indices = @transform_4, window_bounds = array<i64: 1, 100>}, {transform_indices = @transform_5, window_bounds = array<i64: 8, 100>}]} {
    %c0 = arith.constant 0 : index
    %c0_0 = arith.constant 0 : index
    %0 = vector.load %arg1[%c0, %c0_0] : memref<8x100xf32, #tpu.memory_space<vmem>>, vector<8x100xf32>
    %c0_1 = arith.constant 0 : index
    %c0_2 = arith.constant 0 : index
    %1 = vector.load %arg2[%c0_1, %c0_2] : memref<100x128xf32, #tpu.memory_space<vmem>>, vector<100x128xf32>
    %cst = arith.constant dense<0.000000e+00> : vector<8x128xf32>
    %2 = tpu.matmul %0, %1, %cst {dimension_numbers = #tpu.dot_dimension_numbers<[1], [0], [0], [1], [0, 0, 1, 1], [], []>} : vector<8x100xf32>, vector<100x128xf32>, vector<8x128xf32> -> vector<8x128xf32>
    %c0_3 = arith.constant 0 : index
    %c0_4 = arith.constant 0 : index
    %3 = vector.load %arg3[%c0_3, %c0_4] : memref<1x128xf32, #tpu.memory_space<vmem>>, vector<1x128xf32>
    %4 = vector.broadcast %3 : vector<1x128xf32> to vector<8x128xf32>
    %5 = arith.addf %2, %4 : vector<8x128xf32>
    %cst_5 = arith.constant 0.000000e+00 : f32
    %6 = vector.broadcast %cst_5 : f32 to vector<8x128xf32>
    %7 = arith.maximumf %5, %6 : vector<8x128xf32>
    %c0_6 = arith.constant 0 : index
    %c0_7 = arith.constant 0 : index
    %8 = vector.load %arg4[%c0_6, %c0_7] : memref<128x100xf32, #tpu.memory_space<vmem>>, vector<128x100xf32>
    %cst_8 = arith.constant dense<0.000000e+00> : vector<8x100xf32>
    %9 = tpu.matmul %7, %8, %cst_8 {dimension_numbers = #tpu.dot_dimension_numbers<[1], [0], [0], [1], [0, 0, 1, 1], [], []>} : vector<8x128xf32>, vector<128x100xf32>, vector<8x100xf32> -> vector<8x100xf32>
    %c0_9 = arith.constant 0 : index
    %c0_10 = arith.constant 0 : index
    %10 = vector.load %arg5[%c0_9, %c0_10] : memref<1x100xf32, #tpu.memory_space<vmem>>, vector<1x100xf32>
    %11 = vector.broadcast %10 : vector<1x100xf32> to vector<8x100xf32>
    %12 = arith.addf %9, %11 : vector<8x100xf32>
    %c0_11 = arith.constant 0 : index
    %c0_12 = arith.constant 0 : index
    %13 = vector.load %arg6[%c0_11, %c0_12] : memref<8x100xf32, #tpu.memory_space<vmem>>, vector<8x100xf32>
    tpu.vector_store %arg6[%c0_11, %c0_12], %12 {strides = array<i32>} : memref<8x100xf32, #tpu.memory_space<vmem>>, vector<8x100xf32>,
    return
  }
  func.func @transform_0(%arg0: i32) -> (i32, i32) {
    %c0_i32 = arith.constant 0 : i32
    %c0_i32_0 = arith.constant 0 : i32
    return %arg0, %c0_i32 : i32, i32
  }
  func.func @transform_1(%arg0: i32) -> (i32, i32) {
    %c0_i32 = arith.constant 0 : i32
    %c0_i32_0 = arith.constant 0 : i32
    %c0_i32_1 = arith.constant 0 : i32
    return %c0_i32, %c0_i32_0 : i32, i32
  }
  func.func @transform_2(%arg0: i32) -> (i32, i32) {
    %c0_i32 = arith.constant 0 : i32
    %c0_i32_0 = arith.constant 0 : i32
    %c0_i32_1 = arith.constant 0 : i32
    return %c0_i32, %c0_i32_0 : i32, i32
  }
  func.func @transform_3(%arg0: i32) -> (i32, i32) {
    %c0_i32 = arith.constant 0 : i32
    %c0_i32_0 = arith.constant 0 : i32
    %c0_i32_1 = arith.constant 0 : i32
    return %c0_i32, %c0_i32_0 : i32, i32
  }
  func.func @transform_4(%arg0: i32) -> (i32, i32) {
    %c0_i32 = arith.constant 0 : i32
    %c0_i32_0 = arith.constant 0 : i32
    %c0_i32_1 = arith.constant 0 : i32
    return %c0_i32, %c0_i32_0 : i32, i32
  }
  func.func @transform_5(%arg0: i32) -> (i32, i32) {
    %c0_i32 = arith.constant 0 : i32
    %c0_i32_0 = arith.constant 0 : i32
    return %arg0, %c0_i32 : i32, i32
  }
}

</mosaic_0001>

<bundles_post_ra>
// kernel: simple_nn_forward.1
= control target key start
LH: loop header
LB: loop body
LE: loop exit
PB: predicated region body
PF: predicated region fallthrough
CT: control target
= control target key end

     0   :  { %vm46_vm0 = vcmask 1043456   ;;  %v353_v1 = vmov 0.0   ;;  %vm354_vm1 = vmmov 0   ;;  %s518_s0 = inlined_call_operand.vmem [shape: f32[8,100], index: 0, kind: input, shape index: {}]   ;;  %s519_s1 = inlined_call_operand.vmem [shape: f32[100,128], index: 1, kind: input, shape index: {}]   ;;  %s520_s2 = inlined_call_operand.vmem [shape: f32[1,128], index: 2, kind: input, shape index: {}]   ;;  %s521_s3 = inlined_call_operand.vmem [shape: f32[128,100], index: 3, kind: input, shape index: {}]   ;;  %s522_s4 = inlined_call_operand.vmem [shape: f32[1,100], index: 4, kind: input, shape index: {}]   ;;  %s523_s5 = inlined_call_operand.hbm [shape: f32[8,100], index: 5, kind: output, shape index: {}]  }
   0x1   :  { %v34_v0 = vld [vmem:[%s519_s1 + $0x60] sm:$0xf]  ;;  %264 = vmatprep.subr.mxu0 %v353_v1  ;;  %v33_v2 = vld [vmem:[%s519_s1 + $0x58] sm:$0xff]  ;;  %293 = vmatprep.subr.mxu1 %v353_v1  ;;  %v32_v3 = vld [vmem:[%s519_s1 + $0x50] sm:$0xff] }
   0x2   :  { %265 = vmatpush3.msk.msra.mxu0 %vm46_vm0, %v34_v0  ;;  %290 = vmatprep.mubr.msk.f32.mxu0 %vm354_vm1, %v353_v1  ;;  %v136_v4 = vld [vmem:[%s521_s3 + $0x78] sm:$0xff]  ;;  %v31_v5 = vld [vmem:[%s519_s1 + $0x48] sm:$0xff]  ;;  %v135_v6 = vld [vmem:[%s521_s3 + $0x70] sm:$0xff] }
   0x3   :  { %266 = vmatprep.subr.mxu0 %v353_v1  ;;  %325 = vmatprep.mubr.msk.f32.mxu1 %vm354_vm1, %v353_v1  ;;  %v134_v7 = vld [vmem:[%s521_s3 + $0x68] sm:$0xff]  ;;  %v30_v8 = vld [vmem:[%s519_s1 + $0x40] sm:$0xff]  ;;  %v29_v10 = vld [vmem:[%s519_s1 + $0x38] sm:$0xff] }
   0x4   :  { %267 = vmatpush3.msra.mxu0 %v33_v2  ;;  %294 = vmatpush3.msra.mxu1 %v136_v4  ;;  %v133_v9 = vld [vmem:[%s521_s3 + $0x60] sm:$0xff] }
   0x5   :  { %268 = vmatprep.subr.mxu0 %v353_v1  ;;  %295 = vmatprep.subr.mxu1 %v353_v1 }
   0x6   :  { %269 = vmatpush3.msra.mxu0 %v32_v3  ;;  %296 = vmatpush3.msra.mxu1 %v135_v6 }
   0x7   :  { %270 = vmatprep.subr.mxu0 %v353_v1  ;;  %297 = vmatprep.subr.mxu1 %v353_v1 }
   0x8   :  { %271 = vmatpush3.msra.mxu0 %v31_v5  ;;  %298 = vmatpush3.msra.mxu1 %v134_v7 }
   0x9   :  { %272 = vmatprep.subr.mxu0 %v353_v1 }
   0xa   :  { %10 = vsyncpa [#allocation3], 0  ;;  %273 = vmatpush3.msra.mxu0 %v30_v8  ;;  %299 = vmatprep.subr.mxu1 %v353_v1  ;;  %v132_v11 = vld [vmem:[%s521_s3 + $0x58] sm:$0xff]  ;;  %v28_v12 = vld [vmem:[%s519_s1 + $0x30] sm:$0xff]  ;;  %vm42_vm2 = vcmask 818176   ;;  %s355_s30 = smov [#allocation2]  }
   0xb   :  { %274 = vmatprep.subr.mxu0 %v353_v1  ;;  %300 = vmatpush3.msra.mxu1 %v133_v9  ;;  %v131_v13 = vld [vmem:[%s521_s3 + $0x50] sm:$0xff]  ;;  %v27_v14 = vld [vmem:[%s519_s1 + $0x28] sm:$0xff]  ;;  %v26_v16 = vld [vmem:[%s519_s1 + $0x20] sm:$0xff]  ;;  %s221_s6 = sshll.u32 %s355_s30, 4  ;;  %s222_s6 = int_to_ptr.vmem [resolvable:$true] %s221_s6 }
   0xc   :  { %275 = vmatpush3.msra.mxu0 %v29_v10  ;;  %301 = vmatprep.subr.mxu1 %v353_v1  ;;  %v130_v15 = vld [vmem:[%s521_s3 + $0x48] sm:$0xff]  ;;  %v129_v17 = vld [vmem:[%s521_s3 + $0x40] sm:$0xff]  ;;  %v25_v18 = vld [vmem:[%s519_s1 + $0x18] sm:$0xff]  ;;  %p336_p1 = scmp.lt.s32.totalorder %s222_s6, %s222_s6 }
   0xd   :  { %276 = vmatprep.subr.mxu0 %v353_v1  ;;  %302 = vmatpush3.msra.mxu1 %v132_v11  ;;  %v128_v19 = vld [vmem:[%s521_s3 + $0x38] sm:$0xff]  ;;  %v24_v20 = vld [vmem:[%s519_s1 + $0x10] sm:$0xff]  ;;  %v23_v22 = vld [vmem:[%s519_s1 + $0x8] sm:$0xff] }
   0xe   :  { %277 = vmatpush3.msra.mxu0 %v28_v12  ;;  %303 = vmatprep.subr.mxu1 %v353_v1  ;;  %v127_v21 = vld [vmem:[%s521_s3 + $0x30] sm:$0xff]  ;;  %v126_v23 = vld [vmem:[%s521_s3 + $0x28] sm:$0xff]  ;;  %v22_v24 = vld [vmem:[%s519_s1] sm:$0xff] }
   0xf   :  { %278 = vmatprep.subr.mxu0 %v353_v1  ;;  %304 = vmatpush3.msra.mxu1 %v131_v13  ;;  %v21_v25 = vld [vmem:[%s518_s0] sm:$0xff]  ;;  %v124_v27 = vld [vmem:[%s521_s3 + $0x18] sm:$0xff]  ;;  %v123_v28 = vld [vmem:[%s521_s3 + $0x10] sm:$0xff] }
  0x10   :  { %279 = vmatpush3.msra.mxu0 %v27_v14  ;;  %305 = vmatprep.subr.mxu1 %v353_v1  ;;  %v125_v26 = vld [vmem:[%s521_s3 + $0x20] sm:$0xff]  ;;  %v122_v29 = vld [vmem:[%s521_s3 + $0x8] sm:$0xff] }
  0x11   :  { %280 = vmatprep.subr.mxu0 %v353_v1  ;;  %306 = vmatpush3.msra.mxu1 %v130_v15  ;;  %v121_v30 = vld [vmem:[%s521_s3] sm:$0xff]  ;;  %s331_s3 = scalar_lea.vmem %s222_s6, 128 }
  0x12   :  { %281 = vmatpush3.msra.mxu0 %v26_v16  ;;  %307 = vmatprep.subr.mxu1 %v353_v1  ;;  %v229_v31 = vld [vmem:[%s520_s2] ss:$0 sm:$0xff]  ;;  %p332_p0 = scmp.ne.s32.totalorder %s222_s6, %s331_s3  ;;  %p337_p2 = scmp.lt.s32.totalorder %s331_s3, %s331_s3 }
  0x13   :  { %282 = vmatprep.subr.mxu0 %v353_v1  ;;  %308 = vmatpush3.msra.mxu1 %v129_v17  ;;  %v232_v36 = vld [vmem:[%s522_s4] ss:$0 sm:$0xff] }
  0x14   :  { %283 = vmatpush3.msra.mxu0 %v25_v18  ;;  %309 = vmatprep.subr.mxu1 %v353_v1  ;;  %p338_p3 = por %p337_p2, %p336_p1 }
  0x15   :  { %284 = vmatprep.subr.mxu0 %v353_v1  ;;  %310 = vmatpush3.msra.mxu1 %v128_v19 }
  0x16   :  { %285 = vmatpush3.msra.mxu0 %v24_v20  ;;  %311 = vmatprep.subr.mxu1 %v353_v1  ;;  %p339_p4 = pnand %p338_p3, %p332_p0 }
  0x17   :  { %286 = vmatprep.subr.mxu0 %v353_v1  ;;  %312 = vmatpush3.msra.mxu1 %v127_v21 }
  0x18   :  { %287 = vmatpush3.msra.mxu0 %v23_v22  ;;  %313 = vmatprep.subr.mxu1 %v353_v1 }
  0x19   :  { %288 = vmatprep.subr.mxu0 %v353_v1  ;;  %314 = vmatpush3.msra.mxu1 %v126_v23 }
  0x1a   :  { %289 = vmatpush3.msra.mxu0 %v22_v24  ;;  %315 = vmatprep.subr.mxu1 %v353_v1 }
  0x1b   :  { %291 = vmatmul.mubr.msk.f32.vlgmr.msra.gmra.mxu0 %vm42_vm2, %v21_v25  ;;  %316 = vmatpush3.msra.mxu1 %v125_v26 }
  0x1c   :  { %317 = vmatprep.subr.mxu1 %v353_v1 }
  0x1d   :  { %318 = vmatpush3.msra.mxu1 %v124_v27 }
  0x1e   :  { %319 = vmatprep.subr.mxu1 %v353_v1 }
  0x1f   :  { %320 = vmatpush3.msra.mxu1 %v123_v28 }
  0x20   :  { %321 = vmatprep.subr.mxu1 %v353_v1 }
  0x21   :  { %322 = vmatpush3.msra.mxu1 %v122_v29 }
  0x22   :  { %323 = vmatprep.subr.mxu1 %v353_v1 }
  0x23   :  { %324 = vmatpush3.msra.mxu1 %v121_v30 }
  0xdb   :  { %v116_v32 = vpop.f32.mrf.mxu0 }
  0xdc   :  { %v117_v33 = vadd.f32 %v229_v31, %v116_v32 }
  0xdd   :  { %v292_v34 = vpop.f32.mrf.mxu0 }
  0xde   :  { %v120_v35 = vmax.f32 %v117_v33, 0.0 }
  0xe0   :  { %326 = vmatmul.mubr.f32.vlgmr.msra.gmra.mxu1 %v120_v35 }
 0x1a0   :  { %v210_v37 = vpop.f32.mrf.mxu1 }
 0x1a1   :  { %v211_v38 = vadd.f32 %v232_v36, %v210_v37 }
 0x1a2   :  { %v327_v39 = vpop.f32.mrf.mxu1 }
 0x1a3   :  { %214 = vst.msk [vmem:[#allocation2] sm:$0xff] %vm42_vm2, %v211_v38 }
 0x1a4   :  { %342 = shalt.err (!%p339_p4)
}
 0x1a5   :  { %224 = dma.vmem_to_hbm [thread:$0]  %s222_s6, 128, %s523_s5, [#allocation3]  }
 0x1a6   :  { %351 = dma.done.wait [#allocation3], 128  }
 0x1a7   :  { %352 = vsyncadd [#allocation3], 4294967168 }
 0x1a8   :  { %228 = vsyncpa [#allocation3], 1 }

</bundles_post_ra>
